<compile_context>
chip_gen: v5e
topology: v5e:2x2
jax: 0.10.0
libtpu: 0.0.40
codegen_flags: <defaults>
</compile_context>

<pallas_src>
import jax
import jax.numpy as jnp
from jax.experimental import pallas as pl
from jax.experimental.pallas import tpu as pltpu

HIDDEN = 256
LANE = 128   # lane width: mean head padded to a multiple of this
ALIGN = 16   # batch-tile granularity (bf16 sublane packing)


def _round_up(x, m):
    return (x + m - 1) // m * m


def actor_mlp_kernel(x_ref, w1_ref, b1_ref, w2_ref, b2_ref, wm_ref, bm_ref, out_ref):
    """Fused 3-layer MLP: relu(xW1+b1) -> relu(hW2+b2) -> tanh(hWm+bm).

    Inputs/weights are bf16 (MXU operands) with f32 accumulation; bias add,
    relu and tanh stay in f32 (safe on v5e where VPU/EUP lack bf16).  The
    output is stored as bf16 (lane-dense padded width).
    """
    # fc1: (tile_b, state_dim) @ (state_dim, 256)
    h1 = jnp.dot(x_ref[...], w1_ref[...],
                 preferred_element_type=jnp.float32) + b1_ref[...]
    # Cast right after relu: only the bf16 copy stays live (register pressure).
    h1 = jnp.maximum(h1, 0.0).astype(jnp.bfloat16)

    # fc2: (tile_b, 256) @ (256, 256)
    h2 = jnp.dot(h1, w2_ref[...],
                 preferred_element_type=jnp.float32) + b2_ref[...]
    h2 = jnp.maximum(h2, 0.0).astype(jnp.bfloat16)

    # mean head: (tile_b, 256) @ (256, 128-padded)
    mean = jnp.dot(h2, wm_ref[...],
                   preferred_element_type=jnp.float32) + bm_ref[...]
    # bf16 store: halves the dominant HBM writeback stream.
    out_ref[...] = jnp.tanh(mean).astype(out_ref.dtype)


def init_params(key, state_dim, action_dim, hidden=HIDDEN):
    """Deterministic synthetic parameters (PyTorch-Linear-like uniform init), f32."""
    ks = jax.random.split(key, 6)

    def linear(kw, kb, fan_in, fan_out):
        bound = 1.0 / jnp.sqrt(jnp.float32(fan_in))
        w = jax.random.uniform(kw, (fan_in, fan_out), jnp.float32, -bound, bound)
        b = jax.random.uniform(kb, (1, fan_out), jnp.float32, -bound, bound)
        return w, b

    w1, b1 = linear(ks[0], ks[1], state_dim, hidden)
    w2, b2 = linear(ks[2], ks[3], hidden, hidden)
    wm, bm = linear(ks[4], ks[5], hidden, action_dim)
    return {"w1": w1, "b1": b1, "w2": w2, "b2": b2, "wm": wm, "bm": bm}


def prepare_params(p, action_dim):
    """Cast weights to bf16 and zero-pad the mean head to a lane-dense width."""
    out_pad = max(LANE, _round_up(action_dim, LANE))
    wm = jnp.zeros((HIDDEN, out_pad), jnp.float32).at[:, :action_dim].set(p["wm"])
    bm = jnp.zeros((1, out_pad), jnp.float32).at[:, :action_dim].set(p["bm"])
    return {
        "w1": p["w1"].astype(jnp.bfloat16),
        "b1": p["b1"].astype(jnp.float32),
        "w2": p["w2"].astype(jnp.bfloat16),
        "b2": p["b2"].astype(jnp.float32),
        "wm": wm.astype(jnp.bfloat16),
        "bm": bm,
    }


def actor_forward(state, params, action_dim, *, tile_b=1024):
    """Fused ActorNetwork forward pass.

    state:  (B, state_dim) f32 (cast to bf16 once here).
    params: output of prepare_params (bf16 weights, lane-padded mean head).
    Returns mean of shape (B, action_dim), bf16.

    Call this under jax.jit so the pad/cast/slice around the kernel are
    compiled into the same program (avoids a separate eager slice pass).
    """
    B, state_dim = state.shape
    out_pad = params["wm"].shape[1]

    # ---- batch tiling ------------------------------------------------------
    # Per-grid-step overhead (~0.35 us) dominates the tiny per-tile work, so we
    # default to a large tile and clamp it for small batches.  If the whole
    # batch fits in a single step but is big enough to fill two TensorCores,
    # split it in two so the "parallel" batch axis can be sharded across cores
    # (v7x megacore).  Working set at tile_b=1024 is still only a few MiB.
    tile_b = max(ALIGN, min(tile_b, _round_up(B, ALIGN)))
    if B >= 256 and _round_up(B, tile_b) == tile_b:
        tile_b = _round_up(-(-B // 2), ALIGN)
    b_pad = _round_up(B, tile_b)
    grid = (b_pad // tile_b,)

    # bf16 input: halves state DMA; the MXU consumes bf16 anyway.
    x = state.astype(jnp.bfloat16)
    if b_pad != B:
        x = jnp.pad(x, ((0, b_pad - B), (0, 0)))

    def tiled(shape):      # batch-tiled arrays (double-buffered by the pipeline)
        return pl.BlockSpec(shape, lambda i: (i, 0))

    def resident(shape):   # weights/biases: same block every step, single buffer
        return pl.BlockSpec(shape, lambda i: (0, 0), pipeline_mode=pl.Buffered(1))

    args = (x, params["w1"], params["b1"], params["w2"], params["b2"],
            params["wm"], params["bm"])

    flops = 2 * b_pad * (state_dim * HIDDEN + HIDDEN * HIDDEN + HIDDEN * out_pad)
    bytes_accessed = int(
        b_pad * state_dim * 2                                                  # bf16 state in
        + sum(int(params[k].size) * params[k].dtype.itemsize for k in params)  # weights
        + b_pad * out_pad * 2                                                  # bf16 out
    )

    out = pl.pallas_call(
        actor_mlp_kernel,
        out_shape=jax.ShapeDtypeStruct((b_pad, out_pad), jnp.bfloat16),
        grid_spec=pltpu.PrefetchScalarGridSpec(
            num_scalar_prefetch=0,
            grid=grid,
            in_specs=[
                tiled((tile_b, state_dim)),
                resident(params["w1"].shape),
                resident(params["b1"].shape),
                resident(params["w2"].shape),
                resident(params["b2"].shape),
                resident(params["wm"].shape),
                resident(params["bm"].shape),
            ],
            out_specs=tiled((tile_b, out_pad)),
        ),
        compiler_params=pltpu.CompilerParams(
            dimension_semantics=("parallel",),
            vmem_limit_bytes=32 << 20,
        ),
        cost_estimate=pl.CostEstimate(
            flops=flops,
            transcendentals=b_pad * out_pad,
            bytes_accessed=bytes_accessed,
        ),
    )(*args)

    # Slice off batch padding and the zero-padded head columns (fused into the
    # surrounding jit; the padded columns are tanh(0)=0 by construction).
    return out[:B, :action_dim]


def actor_forward_ref(state, p):
    """Pure-JAX f32 reference (semantics check)."""
    h1 = jnp.maximum(state @ p["w1"] + p["b1"], 0.0)
    h2 = jnp.maximum(h1 @ p["w2"] + p["b2"], 0.0)
    return jnp.tanh(h2 @ p["wm"] + p["bm"])


def actor_forward_ref_bf16(state, p):
    """Pure-JAX reference mirroring the kernel's bf16-MXU / f32-accumulate numerics
    (output kept f32 here; the kernel additionally rounds the result to bf16)."""
    bf = jnp.bfloat16
    h1 = jnp.dot(state.astype(bf), p["w1"].astype(bf),
                 preferred_element_type=jnp.float32) + p["b1"]
    h1 = jnp.maximum(h1, 0.0)
    h2 = jnp.dot(h1.astype(bf), p["w2"].astype(bf),
                 preferred_element_type=jnp.float32) + p["b2"]
    h2 = jnp.maximum(h2, 0.0)
    m = jnp.dot(h2.astype(bf), p["wm"].astype(bf),
                preferred_element_type=jnp.float32) + p["bm"]
    return jnp.tanh(m)


if __name__ == "__main__":
    key = jax.random.PRNGKey(0)
    k_state, k_params, k_big = jax.random.split(key, 3)

    state_dim = 16
    action_dim = 8

    params = init_params(k_params, state_dim, action_dim)
    prepared = prepare_params(params, action_dim)

    fwd = jax.jit(actor_forward, static_argnames=("action_dim", "tile_b"))

    # Small batch (single grid step, tile clamped to 16).
    state_small = jax.random.normal(k_state, (8, state_dim), jnp.float32)
    out_small = jax.block_until_ready(
        fwd(state_small, prepared, action_dim=action_dim, tile_b=1024))

    # Larger batch: remainder padding + a 2-step "parallel" batch grid so a
    # 2-TensorCore part (v7x) can split the work across cores.
    state_big = jax.random.normal(k_big, (1000, state_dim), jnp.float32)
    out_big = jax.block_until_ready(
        fwd(state_big, prepared, action_dim=action_dim, tile_b=1024))

    for state, out in ((state_small, out_small), (state_big, out_big)):
        assert out.shape == (state.shape[0], action_dim)
        assert out.dtype == jnp.bfloat16
        o = out.astype(jnp.float32)
        ref_bf16 = actor_forward_ref_bf16(state, params)
        ref_f32 = actor_forward_ref(state, params)
        # bf16 output rounding of tanh in [-1, 1] adds <= ~4e-3 abs error.
        assert jnp.allclose(o, ref_bf16, atol=1e-2, rtol=1e-2), \
            "Pallas output mismatch vs bf16-mirrored reference"
        assert jnp.allclose(o, ref_f32, atol=6e-2, rtol=6e-2), \
            "Pallas output mismatch vs f32 reference"

    print("KERNEL_OK")
</pallas_src>

<mosaic_0001>
module attributes {stable_mosaic.version = 11 : i64} {
  func.func @actor_mlp_kernel(%arg0: i32, %arg1: memref<16x16xbf16, #tpu.memory_space<vmem>>, %arg2: memref<16x256xbf16, #tpu.memory_space<vmem>>, %arg3: memref<1x256xf32, #tpu.memory_space<vmem>>, %arg4: memref<256x256xbf16, #tpu.memory_space<vmem>>, %arg5: memref<1x256xf32, #tpu.memory_space<vmem>>, %arg6: memref<256x128xbf16, #tpu.memory_space<vmem>>, %arg7: memref<1x128xf32, #tpu.memory_space<vmem>>, %arg8: memref<16x128xbf16, #tpu.memory_space<vmem>>) attributes {dimension_semantics = [#tpu.dimension_semantics<parallel>], iteration_bounds = array<i64: 1>, scalar_prefetch = 0 : i64, scratch_operands = 0 : i64, tpu.core_type = #tpu.core_type<tc>, window_params = [{transform_indices = @transform_0, window_bounds = array<i64: 16, 16>}, {pipeline_mode = #tpu.pipeline_mode<synchronous>, transform_indices = @transform_1, window_bounds = array<i64: 16, 256>}, {pipeline_mode = #tpu.pipeline_mode<synchronous>, transform_indices = @transform_2, window_bounds = array<i64: 1, 256>}, {pipeline_mode = #tpu.pipeline_mode<synchronous>, transform_indices = @transform_3, window_bounds = array<i64: 256, 256>}, {pipeline_mode = #tpu.pipeline_mode<synchronous>, transform_indices = @transform_4, window_bounds = array<i64: 1, 256>}, {pipeline_mode = #tpu.pipeline_mode<synchronous>, transform_indices = @transform_5, window_bounds = array<i64: 256, 128>}, {pipeline_mode = #tpu.pipeline_mode<synchronous>, transform_indices = @transform_6, window_bounds = array<i64: 1, 128>}, {transform_indices = @transform_7, window_bounds = array<i64: 16, 128>}]} {
    %c0 = arith.constant 0 : index
    %c0_0 = arith.constant 0 : index
    %0 = vector.load %arg1[%c0, %c0_0] : memref<16x16xbf16, #tpu.memory_space<vmem>>, vector<16x16xbf16>
    %c0_1 = arith.constant 0 : index
    %c0_2 = arith.constant 0 : index
    %1 = vector.load %arg2[%c0_1, %c0_2] : memref<16x256xbf16, #tpu.memory_space<vmem>>, vector<16x256xbf16>
    %cst = arith.constant dense<0.000000e+00> : vector<16x256xf32>
    %2 = tpu.matmul %0, %1, %cst {dimension_numbers = #tpu.dot_dimension_numbers<[1], [0], [0], [1], [0, 0, 1, 1], [], []>} : vector<16x16xbf16>, vector<16x256xbf16>, vector<16x256xf32> -> vector<16x256xf32>
    %c0_3 = arith.constant 0 : index
    %c0_4 = arith.constant 0 : index
    %3 = vector.load %arg3[%c0_3, %c0_4] : memref<1x256xf32, #tpu.memory_space<vmem>>, vector<1x256xf32>
    %4 = vector.broadcast %3 : vector<1x256xf32> to vector<16x256xf32>
    %5 = arith.addf %2, %4 : vector<16x256xf32>
    %cst_5 = arith.constant 0.000000e+00 : f32
    %6 = vector.broadcast %cst_5 : f32 to vector<16x256xf32>
    %7 = arith.maximumf %5, %6 : vector<16x256xf32>
    %8 = arith.truncf %7 : vector<16x256xf32> to vector<16x256xbf16>
    %c0_6 = arith.constant 0 : index
    %c0_7 = arith.constant 0 : index
    %9 = vector.load %arg4[%c0_6, %c0_7] : memref<256x256xbf16, #tpu.memory_space<vmem>>, vector<256x256xbf16>
    %cst_8 = arith.constant dense<0.000000e+00> : vector<16x256xf32>
    %10 = tpu.matmul %8, %9, %cst_8 {dimension_numbers = #tpu.dot_dimension_numbers<[1], [0], [0], [1], [0, 0, 1, 1], [], []>} : vector<16x256xbf16>, vector<256x256xbf16>, vector<16x256xf32> -> vector<16x256xf32>
    %c0_9 = arith.constant 0 : index
    %c0_10 = arith.constant 0 : index
    %11 = vector.load %arg5[%c0_9, %c0_10] : memref<1x256xf32, #tpu.memory_space<vmem>>, vector<1x256xf32>
    %12 = vector.broadcast %11 : vector<1x256xf32> to vector<16x256xf32>
    %13 = arith.addf %10, %12 : vector<16x256xf32>
    %cst_11 = arith.constant 0.000000e+00 : f32
    %14 = vector.broadcast %cst_11 : f32 to vector<16x256xf32>
    %15 = arith.maximumf %13, %14 : vector<16x256xf32>
    %16 = arith.truncf %15 : vector<16x256xf32> to vector<16x256xbf16>
    %c0_12 = arith.constant 0 : index
    %c0_13 = arith.constant 0 : index
    %17 = vector.load %arg6[%c0_12, %c0_13] : memref<256x128xbf16, #tpu.memory_space<vmem>>, vector<256x128xbf16>
    %cst_14 = arith.constant dense<0.000000e+00> : vector<16x128xf32>
    %18 = tpu.matmul %16, %17, %cst_14 {dimension_numbers = #tpu.dot_dimension_numbers<[1], [0], [0], [1], [0, 0, 1, 1], [], []>} : vector<16x256xbf16>, vector<256x128xbf16>, vector<16x128xf32> -> vector<16x128xf32>
    %c0_15 = arith.constant 0 : index
    %c0_16 = arith.constant 0 : index
    %19 = vector.load %arg7[%c0_15, %c0_16] : memref<1x128xf32, #tpu.memory_space<vmem>>, vector<1x128xf32>
    %20 = vector.broadcast %19 : vector<1x128xf32> to vector<16x128xf32>
    %21 = arith.addf %18, %20 : vector<16x128xf32>
    %22 = math.tanh %21 : vector<16x128xf32>
    %23 = arith.truncf %22 : vector<16x128xf32> to vector<16x128xbf16>
    %c0_17 = arith.constant 0 : index
    %c0_18 = arith.constant 0 : index
    %24 = vector.load %arg8[%c0_17, %c0_18] : memref<16x128xbf16, #tpu.memory_space<vmem>>, vector<16x128xbf16>
    tpu.vector_store %arg8[%c0_17, %c0_18], %23 {strides = array<i32>} : memref<16x128xbf16, #tpu.memory_space<vmem>>, vector<16x128xbf16>,
    return
  }
  func.func @transform_0(%arg0: i32) -> (i32, i32) {
    %c0_i32 = arith.constant 0 : i32
    %c0_i32_0 = arith.constant 0 : i32
    return %arg0, %c0_i32 : i32, i32
  }
  func.func @transform_1(%arg0: i32) -> (i32, i32) {
    %c0_i32 = arith.constant 0 : i32
    %c0_i32_0 = arith.constant 0 : i32
    %c0_i32_1 = arith.constant 0 : i32
    return %c0_i32, %c0_i32_0 : i32, i32
  }
  func.func @transform_2(%arg0: i32) -> (i32, i32) {
    %c0_i32 = arith.constant 0 : i32
    %c0_i32_0 = arith.constant 0 : i32
    %c0_i32_1 = arith.constant 0 : i32
    return %c0_i32, %c0_i32_0 : i32, i32
  }
  func.func @transform_3(%arg0: i32) -> (i32, i32) {
    %c0_i32 = arith.constant 0 : i32
    %c0_i32_0 = arith.constant 0 : i32
    %c0_i32_1 = arith.constant 0 : i32
    return %c0_i32, %c0_i32_0 : i32, i32
  }
  func.func @transform_4(%arg0: i32) -> (i32, i32) {
    %c0_i32 = arith.constant 0 : i32
    %c0_i32_0 = arith.constant 0 : i32
    %c0_i32_1 = arith.constant 0 : i32
    return %c0_i32, %c0_i32_0 : i32, i32
  }
  func.func @transform_5(%arg0: i32) -> (i32, i32) {
    %c0_i32 = arith.constant 0 : i32
    %c0_i32_0 = arith.constant 0 : i32
    %c0_i32_1 = arith.constant 0 : i32
    return %c0_i32, %c0_i32_0 : i32, i32
  }
  func.func @transform_6(%arg0: i32) -> (i32, i32) {
    %c0_i32 = arith.constant 0 : i32
    %c0_i32_0 = arith.constant 0 : i32
    %c0_i32_1 = arith.constant 0 : i32
    return %c0_i32, %c0_i32_0 : i32, i32
  }
  func.func @transform_7(%arg0: i32) -> (i32, i32) {
    %c0_i32 = arith.constant 0 : i32
    %c0_i32_0 = arith.constant 0 : i32
    return %arg0, %c0_i32 : i32, i32
  }
}

</mosaic_0001>

<bundles_post_ra>
// kernel: actor_forward.1
= control target key start
LH: loop header
LB: loop body
LE: loop exit
PB: predicated region body
PF: predicated region fallthrough
CT: control target
= control target key end

     0   :  { %12 = vsyncpa [#allocation3], 0  ;;  %s960_s0 = inlined_call_operand.vmem [shape: bf16[16,16], index: 0, kind: input, shape index: {}]   ;;  %s961_s1 = inlined_call_operand.vmem [shape: bf16[16,256], index: 1, kind: input, shape index: {}]   ;;  %s962_s2 = inlined_call_operand.vmem [shape: f32[1,256], index: 2, kind: input, shape index: {}]   ;;  %s963_s3 = inlined_call_operand.hbm [shape: bf16[256,256], index: 3, kind: input, shape index: {}]   ;;  %s964_s4 = inlined_call_operand.vmem [shape: f32[1,256], index: 4, kind: input, shape index: {}]   ;;  %s965_s5 = inlined_call_operand.hbm [shape: bf16[256,128], index: 5, kind: input, shape index: {}]   ;;  %s966_s6 = inlined_call_operand.vmem [shape: f32[1,128], index: 6, kind: input, shape index: {}]   ;;  %s967_s7 = inlined_call_operand.vmem [shape: bf16[16,128], index: 7, kind: output, shape index: {}]  }
   0x1   :  { %s24_s26 = sshll.u32 %s963_s3, 4  ;;  %s25_s26 = int_to_ptr.hbm [resolvable:$true] %s24_s26 }
   0x2   :  { %13 = vsyncpa [#allocation5], 0  ;;  %s879_s27 = smov [#allocation2]   ;;  %s39_s8 = sshll.u32 %s965_s5, 4  ;;  %s40_s8 = int_to_ptr.hbm [resolvable:$true] %s39_s8 }
   0x3   :  { %s26_s28 = sshll.u32 %s879_s27, 4  ;;  %s880_s9 = smov 128   ;;  %s27_s28 = int_to_ptr.vmem [resolvable:$true] %s26_s28 }
   0x4   :  { %s881_s10 = smov 8   ;;  %s882_s11 = smov [#allocation4]  }
   0x5   :  { %32 = dma.hbm_to_vmem [thread:$0]  %s25_s26, 4096, %s27_s28, [#allocation3], %s880_s9, %s880_s9, %s881_s10  }
   0x6   :  { %s41_s12 = sshll.u32 %s882_s11, 4  ;;  %s883_s13 = smov 64   ;;  %s42_s12 = int_to_ptr.vmem [resolvable:$true] %s41_s12 }
   0x7   :  { %s884_s14 = smov 4  }
   0x8   :  { %47 = dma.hbm_to_vmem [thread:$0]  %s40_s8, 2048, %s42_s12, [#allocation5], %s883_s13, %s883_s13, %s884_s14  }
   0x9   :  { %875 = dma.done.wait [#allocation3], 4096  }
   0xa   :  { %876 = vsyncadd [#allocation3], 4294963200 }
   0xb   :  { %877 = dma.done.wait [#allocation5], 2048  }
   0xc   :  { %878 = vsyncadd [#allocation5], 4294965248  ;;  %v560_v0 = vld [vmem:[%s961_s1] sm:$0xf]  ;;  %v762_v1 = vld [vmem:[%s961_s1 + $0x4] sm:$0xf0] }
   0xd   :  { %v761_v2 = vld [vmem:[%s961_s1 + $0x4] sm:$0xf]  ;;  %v561_v3 = vor.u32 %v762_v1, %v560_v0  ;;  %v562_v4 = vld [vmem:[%s961_s1 + $0x8] sm:$0xf0]  ;;  %vm84_vm0 = vcmask 130048  }
   0xe   :  { %v760_v5 = vld [vmem:[%s960_s0] sm:$0xff]  ;;  %v565_v7 = vor.u32 %v761_v2, %v562_v4  ;;  %v778_v8 = vld [vmem:[#allocation2 + $0x74] sm:$0xf0]  ;;  %v628_v14 = vld [vmem:[#allocation2 + $0x78] sm:$0xf0] }
   0xf   :  { %v626_v6 = vld [vmem:[#allocation2 + $0x70] sm:$0xf]  ;;  %v794_v10 = vld [vmem:[#allocation2 + $0xf4] sm:$0xf0]  ;;  %95 = vmatpush.bf16.msra.mxu0 %v561_v3  ;;  %v777_v13 = vld [vmem:[#allocation2 + $0x74] sm:$0xf] }
  0x10   :  { %v690_v9 = vld [vmem:[#allocation2 + $0xf0] sm:$0xf]  ;;  %v627_v11 = vor.u32 %v778_v8, %v626_v6  ;;  %v793_v15 = vld [vmem:[#allocation2 + $0xf4] sm:$0xf]  ;;  %109 = vmatpush.bf16.msra.mxu1 %v565_v7  ;;  %v631_v16 = vor.u32 %v777_v13, %v628_v14  ;;  %v692_v17 = vld [vmem:[#allocation2 + $0xf8] sm:$0xf0] }
  0x11   :  { %v691_v12 = vor.u32 %v794_v10, %v690_v9  ;;  %v618_v18 = vld [vmem:[#allocation2 + $0x60] sm:$0xf]  ;;  %v776_v19 = vld [vmem:[#allocation2 + $0x64] sm:$0xf0]  ;;  %v695_v20 = vor.u32 %v793_v15, %v692_v17  ;;  %v775_v24 = vld [vmem:[#allocation2 + $0x64] sm:$0xf] }
  0x12   :  { %320 = vmatpush.bf16.msra.mxu2 %v627_v11  ;;  %v619_v21 = vor.u32 %v776_v19, %v618_v18  ;;  %v682_v22 = vld [vmem:[#allocation2 + $0xe0] sm:$0xf]  ;;  %v792_v23 = vld [vmem:[#allocation2 + $0xe4] sm:$0xf0]  ;;  %566 = vmatmul.msk.bf16.vlgmr.msra.gmra.mxu0 %vm84_vm0, %v760_v5  ;;  %v620_v26 = vld [vmem:[#allocation2 + $0x68] sm:$0xf0] }
  0x13   :  { %334 = vmatpush.bf16.msra.mxu3 %v691_v12  ;;  %v683_v25 = vor.u32 %v792_v23, %v682_v22  ;;  %v791_v27 = vld [vmem:[#allocation2 + $0xe4] sm:$0xf]  ;;  %v684_v28 = vld [vmem:[#allocation2 + $0xe8] sm:$0xf0]  ;;  %567 = vmatmul.msk.bf16.vlgmr.msra.gmra.mxu1 %vm84_vm0, %v760_v5  ;;  %v623_v29 = vor.u32 %v775_v24, %v620_v26  ;;  %v610_v30 = vld [vmem:[#allocation2 + $0x50] sm:$0xf] }
  0x14   :  { %348 = vmatpush.bf16.msrb.mxu0 %v631_v16  ;;  %v774_v31 = vld [vmem:[#allocation2 + $0x54] sm:$0xf0]  ;;  %v674_v32 = vld [vmem:[#allocation2 + $0xd0] sm:$0xf]  ;;  %362 = vmatpush.bf16.msrb.mxu1 %v695_v20  ;;  %v687_v33 = vor.u32 %v791_v27, %v684_v28  ;;  %v773_v35 = vld [vmem:[#allocation2 + $0x54] sm:$0xf] }
  0x15   :  { %v790_v34 = vld [vmem:[#allocation2 + $0xd4] sm:$0xf0]  ;;  %v612_v36 = vld [vmem:[#allocation2 + $0x58] sm:$0xf0]  ;;  %v611_v37 = vor.u32 %v774_v31, %v610_v30  ;;  %v789_v39 = vld [vmem:[#allocation2 + $0xd4] sm:$0xf] }
  0x16   :  { %321 = vmatpush.bf16.msra.mxu2 %v619_v21  ;;  %v675_v38 = vor.u32 %v790_v34, %v674_v32  ;;  %v676_v40 = vld [vmem:[#allocation2 + $0xd8] sm:$0xf0]  ;;  %v602_v41 = vld [vmem:[#allocation2 + $0x40] sm:$0xf]  ;;  %v772_v42 = vld [vmem:[#allocation2 + $0x44] sm:$0xf0]  ;;  %v615_v45 = vor.u32 %v773_v35, %v612_v36 }
  0x17   :  { %335 = vmatpush.bf16.msra.mxu3 %v683_v25  ;;  %v666_v43 = vld [vmem:[#allocation2 + $0xc0] sm:$0xf]  ;;  %v788_v44 = vld [vmem:[#allocation2 + $0xc4] sm:$0xf0]  ;;  %v679_v46 = vor.u32 %v789_v39, %v676_v40  ;;  %v771_v47 = vld [vmem:[#allocation2 + $0x44] sm:$0xf]  ;;  %v603_v49 = vor.u32 %v772_v42, %v602_v41 }
  0x18   :  { %349 = vmatpush.bf16.msrb.mxu0 %v623_v29  ;;  %363 = vmatpush.bf16.msrb.mxu1 %v687_v33  ;;  %v604_v48 = vld [vmem:[#allocation2 + $0x48] sm:$0xf0]  ;;  %v667_v50 = vor.u32 %v788_v44, %v666_v43  ;;  %v787_v51 = vld [vmem:[#allocation2 + $0xc4] sm:$0xf]  ;;  %v594_v55 = vld [vmem:[#allocation2 + $0x30] sm:$0xf] }
  0x19   :  { %v668_v52 = vld [vmem:[#allocation2 + $0xc8] sm:$0xf0]  ;;  %v607_v53 = vor.u32 %v771_v47, %v604_v48  ;;  %v770_v56 = vld [vmem:[#allocation2 + $0x34] sm:$0xf0]  ;;  %v658_v57 = vld [vmem:[#allocation2 + $0xb0] sm:$0xf] }
  0x1a   :  { %322 = vmatpush.bf16.msra.mxu2 %v611_v37  ;;  %v671_v54 = vor.u32 %v787_v51, %v668_v52  ;;  %v595_v58 = vor.u32 %v770_v56, %v594_v55  ;;  %v786_v59 = vld [vmem:[#allocation2 + $0xb4] sm:$0xf0]  ;;  %v769_v60 = vld [vmem:[#allocation2 + $0x34] sm:$0xf]  ;;  %v596_v61 = vld [vmem:[#allocation2 + $0x38] sm:$0xf0] }
  0x1b   :  { %336 = vmatpush.bf16.msra.mxu3 %v675_v38  ;;  %v659_v62 = vor.u32 %v786_v59, %v658_v57  ;;  %v599_v63 = vor.u32 %v769_v60, %v596_v61  ;;  %v785_v0 = vld [vmem:[#allocation2 + $0xb4] sm:$0xf]  ;;  %v660_v1 = vld [vmem:[#allocation2 + $0xb8] sm:$0xf0]  ;;  %v586_v3 = vld [vmem:[#allocation2 + $0x20] sm:$0xf] }
  0x1c   :  { %350 = vmatpush.bf16.msrb.mxu0 %v615_v45  ;;  %364 = vmatpush.bf16.msrb.mxu1 %v679_v46  ;;  %v663_v2 = vor.u32 %v785_v0, %v660_v1  ;;  %v768_v4 = vld [vmem:[#allocation2 + $0x24] sm:$0xf0]  ;;  %v650_v6 = vld [vmem:[#allocation2 + $0xa0] sm:$0xf]  ;;  %v767_v8 = vld [vmem:[#allocation2 + $0x24] sm:$0xf] }
  0x1d   :  { %v587_v5 = vor.u32 %v768_v4, %v586_v3  ;;  %v784_v7 = vld [vmem:[#allocation2 + $0xa4] sm:$0xf0]  ;;  %v588_v10 = vld [vmem:[#allocation2 + $0x28] sm:$0xf0]  ;;  %v783_v11 = vld [vmem:[#allocation2 + $0xa4] sm:$0xf] }
  0x1e   :  { %323 = vmatpush.bf16.msra.mxu2 %v603_v49  ;;  %v651_v9 = vor.u32 %v784_v7, %v650_v6  ;;  %v652_v12 = vld [vmem:[#allocation2 + $0xa8] sm:$0xf0]  ;;  %v591_v13 = vor.u32 %v767_v8, %v588_v10  ;;  %v578_v15 = vld [vmem:[#allocation2 + $0x10] sm:$0xf]  ;;  %v766_v16 = vld [vmem:[#allocation2 + $0x14] sm:$0xf0] }
  0x1f   :  { %337 = vmatpush.bf16.msra.mxu3 %v667_v50  ;;  %v655_v14 = vor.u32 %v783_v11, %v652_v12  ;;  %v642_v17 = vld [vmem:[#allocation2 + $0x90] sm:$0xf]  ;;  %v579_v18 = vor.u32 %v766_v16, %v578_v15  ;;  %v782_v19 = vld [vmem:[#allocation2 + $0x94] sm:$0xf0]  ;;  %v765_v20 = vld [vmem:[#allocation2 + $0x14] sm:$0xf] }
  0x20   :  { %351 = vmatpush.bf16.msrb.mxu0 %v607_v53  ;;  %365 = vmatpush.bf16.msrb.mxu1 %v671_v54  ;;  %v580_v21 = vld [vmem:[#allocation2 + $0x18] sm:$0xf0]  ;;  %v643_v22 = vor.u32 %v782_v19, %v642_v17  ;;  %v781_v24 = vld [vmem:[#allocation2 + $0x94] sm:$0xf]  ;;  %v570_v27 = vld [vmem:[#allocation2] sm:$0xf] }
  0x21   :  { %v583_v23 = vor.u32 %v765_v20, %v580_v21  ;;  %v644_v25 = vld [vmem:[#allocation2 + $0x98] sm:$0xf0]  ;;  %v764_v28 = vld [vmem:[#allocation2 + $0x4] sm:$0xf0]  ;;  %v634_v29 = vld [vmem:[#allocation2 + $0x80] sm:$0xf] }
  0x22   :  { %324 = vmatpush.bf16.msra.mxu2 %v595_v58  ;;  %v647_v26 = vor.u32 %v781_v24, %v644_v25  ;;  %v571_v30 = vor.u32 %v764_v28, %v570_v27  ;;  %v780_v31 = vld [vmem:[#allocation2 + $0x84] sm:$0xf0]  ;;  %v763_v32 = vld [vmem:[#allocation2 + $0x4] sm:$0xf]  ;;  %v572_v33 = vld [vmem:[#allocation2 + $0x8] sm:$0xf0] }
  0x23   :  { %338 = vmatpush.bf16.msra.mxu3 %v659_v62  ;;  %v635_v34 = vor.u32 %v780_v31, %v634_v29  ;;  %v575_v35 = vor.u32 %v763_v32, %v572_v33  ;;  %v779_v36 = vld [vmem:[#allocation2 + $0x84] sm:$0xf]  ;;  %v636_v37 = vld [vmem:[#allocation2 + $0x88] sm:$0xf0]  ;;  %v810_v39 = vld [vmem:[#allocation4 + $0x78] sm:$0xff] }
  0x24   :  { %352 = vmatpush.bf16.msrb.mxu0 %v599_v63  ;;  %366 = vmatpush.bf16.msrb.mxu1 %v663_v2  ;;  %v639_v38 = vor.u32 %v779_v36, %v636_v37  ;;  %v802_v40 = vld [vmem:[#allocation4 + $0x38] sm:$0xff]  ;;  %v809_v41 = vld [vmem:[#allocation4 + $0x70] sm:$0xff]  ;;  %v808_v43 = vld [vmem:[#allocation4 + $0x68] sm:$0xff] }
  0x25   :  { %v801_v42 = vld [vmem:[#allocation4 + $0x30] sm:$0xff]  ;;  %v807_v44 = vld [vmem:[#allocation4 + $0x60] sm:$0xff]  ;;  %v800_v62 = vld [vmem:[#allocation4 + $0x28] sm:$0xff] }
  0x26   :  { %325 = vmatpush.bf16.msra.mxu2 %v587_v5  ;;  %v63_v45 = vld [vmem:[%s962_s2] sm:$0x3]  ;;  %v806_v63 = vld [vmem:[#allocation4 + $0x58] sm:$0xff]  ;;  %v799_v0 = vld [vmem:[#allocation4 + $0x20] sm:$0xff] }
  0x27   :  { %339 = vmatpush.bf16.msra.mxu3 %v651_v9  ;;  %v65_v48 = vperm.slane %v63_v45, 0  ;;  %v66_v49 = vperm.slane %v63_v45, 1  ;;  %v805_v1 = vld [vmem:[#allocation4 + $0x50] sm:$0xff]  ;;  %v798_v2 = vld [vmem:[#allocation4 + $0x18] sm:$0xff]  ;;  %v804_v3 = vld [vmem:[#allocation4 + $0x48] sm:$0xff] }
  0x28   :  { %353 = vmatpush.bf16.msrb.mxu0 %v591_v13  ;;  %367 = vmatpush.bf16.msrb.mxu1 %v655_v14  ;;  %v797_v4 = vld [vmem:[#allocation4 + $0x10] sm:$0xff]  ;;  %v803_v5 = vld [vmem:[#allocation4 + $0x40] sm:$0xff]  ;;  %v796_v6 = vld [vmem:[#allocation4 + $0x8] sm:$0xff] }
  0x29   :  { %v795_v7 = vld [vmem:[#allocation4] sm:$0xff]  ;;  %v154_v8 = vld [vmem:[%s964_s4] sm:$0x3] }
  0x2a   :  { %326 = vmatpush.bf16.msra.mxu2 %v579_v18  ;;  %v157_v10 = vperm.slane %v154_v8, 1  ;;  %v156_v14 = vperm.slane %v154_v8, 0 }
  0x2b   :  { %340 = vmatpush.bf16.msra.mxu3 %v643_v22 }
  0x2c   :  { %354 = vmatpush.bf16.msrb.mxu0 %v583_v23  ;;  %368 = vmatpush.bf16.msrb.mxu1 %v647_v26 }
  0x2e   :  { %327 = vmatpush.bf16.msra.mxu2 %v571_v30 }
  0x2f   :  { %341 = vmatpush.bf16.msra.mxu3 %v635_v34  ;;  %v822_v34 = vld [vmem:[%s966_s6] ss:$0 sm:$0xff] }
  0x30   :  { %355 = vmatpush.bf16.msrb.mxu0 %v575_v35  ;;  %369 = vmatpush.bf16.msrb.mxu1 %v639_v38 }
  0x32   :  { %514 = vmatpush.bf16.msrb.mxu2 %v802_v40 }
  0x33   :  { %528 = vmatpush.bf16.msrb.mxu3 %v810_v39 }
  0x36   :  { %515 = vmatpush.bf16.msrb.mxu2 %v801_v42 }
  0x37   :  { %529 = vmatpush.bf16.msrb.mxu3 %v809_v41 }
  0x3a   :  { %516 = vmatpush.bf16.msrb.mxu2 %v800_v62 }
  0x3b   :  { %530 = vmatpush.bf16.msrb.mxu3 %v808_v43 }
  0x3e   :  { %517 = vmatpush.bf16.msrb.mxu2 %v799_v0 }
  0x3f   :  { %531 = vmatpush.bf16.msrb.mxu3 %v807_v44 }
  0x42   :  { %518 = vmatpush.bf16.msrb.mxu2 %v798_v2 }
  0x43   :  { %532 = vmatpush.bf16.msrb.mxu3 %v806_v63 }
  0x46   :  { %519 = vmatpush.bf16.msrb.mxu2 %v797_v4 }
  0x47   :  { %533 = vmatpush.bf16.msrb.mxu3 %v805_v1 }
  0x4a   :  { %520 = vmatpush.bf16.msrb.mxu2 %v796_v6 }
  0x4b   :  { %534 = vmatpush.bf16.msrb.mxu3 %v804_v3 }
  0x4e   :  { %521 = vmatpush.bf16.msrb.mxu2 %v795_v7 }
  0x4f   :  { %535 = vmatpush.bf16.msrb.mxu3 %v803_v5 }
  0x8f   :  { %v97_v46 = vpop.f32.mrf.mxu0 }
  0x90   :  { %v111_v47 = vpop.f32.mrf.mxu1  ;;  %v98_v50 = vadd.f32 %v97_v46, %v65_v48 }
  0x91   :  { %v112_v51 = vadd.f32 %v111_v47, %v66_v49 }
  0x92   :  { %v116_v56 = vmax.f32 %v98_v50, 0.0 }
  0x93   :  { %v117_v58 = vmax.f32 %v112_v51, 0.0 }
  0x97   :  { %v99_v52 = vpop.f32.mrf.mxu0 }
  0x98   :  { %v100_v53 = vadd.f32 %v99_v52, %v65_v48  ;;  %v113_v54 = vpop.f32.mrf.mxu1 }
  0x99   :  { %v114_v55 = vadd.f32 %v113_v54, %v66_v49 }
  0x9a   :  { %v118_v57 = vmax.f32 %v100_v53, 0.0 }
  0x9b   :  { %v119_v59 = vmax.f32 %v114_v55, 0.0 }
  0x9c   :  { %v120_v60 = vpack.c.bf16 %v118_v57, %v116_v56 }
  0x9d   :  { %v121_v61 = vpack.c.bf16 %v119_v59, %v117_v58 }
  0x9e   :  { %328 = vmatmul.bf16.vlgmr.msra.gmra.mxu2 %v120_v60  ;;  %356 = vmatmul.bf16.vlgmr.msrb.gmra.mxu0 %v120_v60 }
  0x9f   :  { %342 = vmatmul.bf16.vlgmr.msra.gmra.mxu3 %v121_v61  ;;  %370 = vmatmul.bf16.vlgmr.msrb.gmra.mxu1 %v121_v61 }
 0x11b   :  { %v357_v9 = vpop.f32.mrf.mxu0 }
 0x11c   :  { %v371_v11 = vpop.f32.mrf.mxu1  ;;  %v358_v12 = vadd.f32 %v357_v9, %v157_v10 }
 0x11e   :  { %v372_v17 = vadd.f32 %v371_v11, %v358_v12 }
 0x120   :  { %v377_v22 = vmax.f32 %v372_v17, 0.0 }
 0x121   :  { %v329_v13 = vpop.f32.mrf.mxu2 }
 0x122   :  { %v343_v15 = vpop.f32.mrf.mxu3  ;;  %v330_v20 = vadd.f32 %v329_v13, %v156_v14 }
 0x123   :  { %v359_v16 = vpop.f32.mrf.mxu0 }
 0x124   :  { %v360_v18 = vadd.f32 %v359_v16, %v157_v10  ;;  %v373_v19 = vpop.f32.mrf.mxu1  ;;  %v344_v25 = vadd.f32 %v343_v15, %v330_v20 }
 0x126   :  { %v374_v21 = vadd.f32 %v373_v19, %v360_v18  ;;  %v376_v30 = vmax.f32 %v344_v25, 0.0 }
 0x128   :  { %v379_v23 = vmax.f32 %v374_v21, 0.0 }
 0x129   :  { %v331_v24 = vpop.f32.mrf.mxu2 }
 0x12a   :  { %v381_v26 = vpack.c.bf16 %v379_v23, %v377_v22  ;;  %v332_v27 = vadd.f32 %v331_v24, %v156_v14  ;;  %v345_v28 = vpop.f32.mrf.mxu3 }
 0x12c   :  { %v346_v29 = vadd.f32 %v345_v28, %v332_v27  ;;  %536 = vmatmul.bf16.vlgmr.msrb.gmra.mxu3 %v381_v26 }
 0x12e   :  { %v378_v31 = vmax.f32 %v346_v29, 0.0 }
 0x130   :  { %v380_v32 = vpack.c.bf16 %v378_v31, %v376_v30 }
 0x132   :  { %522 = vmatmul.bf16.vlgmr.msrb.gmra.mxu2 %v380_v32 }
 0x1af   :  { %v537_v33 = vpop.f32.mrf.mxu3 }
 0x1b5   :  { %v523_v35 = vpop.f32.mrf.mxu2 }
 0x1b6   :  { %v524_v36 = vadd.f32 %v822_v34, %v523_v35 }
 0x1b7   :  { %v539_v40 = vpop.f32.mrf.mxu3 }
 0x1b8   :  { %v538_v37 = vadd.f32 %v537_v33, %v524_v36 }
 0x1ba   :  { %823 = vtanh.f32 %v538_v37 }
 0x1bd   :  { %v525_v38 = vpop.f32.mrf.mxu2 }
 0x1be   :  { %v526_v39 = vadd.f32 %v822_v34, %v525_v38 }
 0x1c0   :  { %v540_v41 = vadd.f32 %v539_v40, %v526_v39  ;;  %v824_v42 = vpop.eup %823 }
 0x1c2   :  { %825 = vtanh.f32 %v540_v41 }
 0x1c8   :  { %v826_v43 = vpop.eup %825 }
 0x1c9   :  { %v814_v44 = vpack.c.bf16 %v826_v43, %v824_v42 }
 0x1cb   :  { %815 = vst [vmem:[%s967_s7] sm:$0xff] %v814_v44  }
 0x1cc   :  { %552 = vsyncpa [#allocation3], 1 }
 0x1cd   :  { %553 = vsyncpa [#allocation5], 1 }

</bundles_post_ra>
